<compile_context>
chip_gen: v6e
topology: v6e:2x2x1
jax: 0.10.0
libtpu: 0.0.40
codegen_flags: <defaults>
</compile_context>

<pallas_src>
import functools

import jax
import jax.numpy as jnp
from jax import lax
from jax.experimental import pallas as pl
from jax.experimental.pallas import tpu as pltpu


def _round_up(x, m):
    return (x + m - 1) // m * m


def _num_tensorcores():
    # TODO(synk): verify on v7x that a plain "parallel" leading grid axis really
    # shards across both TensorCores; if it does not, switch that axis to
    # pltpu.CORE_PARALLEL (or pl.core_map) — cannot be verified in-script here.
    try:
        kind = jax.devices()[0].device_kind.lower()
    except Exception:
        return 1
    return 2 if "v7" in kind else 1


def _plan_tiles(K, B, N, tile_n=None):
    """Pick (TN, num_tiles, num_chunks) for streaming the database axis N."""
    if tile_n is None:
        # ~1.25 MiB of streamed bf16 traffic per grid step (V col: 2K bytes,
        # S col: 2B bytes) so DMA, not the ~0.35us fixed step cost, dominates.
        target_bytes = 1280 * 1024
        tn = max(128, (target_bytes // (2 * (K + B))) // 128 * 128)
        # VMEM budget per streamed column: double-buffered V (4K) + S (4B) bf16,
        # f32 accumulator (4B) and ~3 f32 element-wise temps (12B).  Keep the
        # total under ~12 MiB so every generation's scoped default is safe.
        per_col = 4 * K + 20 * B
        tn = min(tn, max(128, (12 * 1024 * 1024 // per_col) // 128 * 128))
    else:
        tn = _round_up(int(tile_n), 128)
    tn = min(tn, _round_up(N, 128))
    nt = -(-N // tn)
    nc = 2 if (_num_tensorcores() >= 2 and nt >= 2) else 1
    nt = _round_up(nt, nc)
    return tn, nt, nc


def prepare_streams(V, S, *, tile_n=None):
    """One-time preparation of the persistent streamed operands.

    V: (N, K) with entries in {-1, +1} -> returned as (K, N_pad) bfloat16 (exact).
    S: (B, N) with entries in {0, 1}   -> returned as (B, N_pad) bfloat16 (exact).

    Call this once (V and S persist across DCHUC training iterations) so the
    cast / transpose / zero-pad is not paid on every loss evaluation.  The
    zero-padded columns contribute exactly 0 to the loss.
    NOTE: bf16 streaming is exact only because V is +-1 valued and S is {0,1}
    valued; a relaxed/continuous V variant should stay in f32.
    """
    N, K = V.shape
    B = S.shape[0]
    tn, nt, _ = _plan_tiles(K, B, N, tile_n)
    n_pad = nt * tn
    Vt = jnp.asarray(V, jnp.bfloat16).T
    Sb = jnp.asarray(S, jnp.bfloat16)
    if n_pad != N:
        Vt = jnp.pad(Vt, ((0, 0), (0, n_pad - N)))
        Sb = jnp.pad(Sb, ((0, 0), (0, n_pad - N)))
    return Vt, Sb


def _dchuc_kernel(u_ref, vt_ref, s_ref, g_ref, s1_ref, w_ref, l_ref, vo_ref,
                  out_ref, acc_ref, *, gamma, code_length, alpha, mu):
    """grid = (num_chunks, tiles_per_chunk); axis 0 'parallel', axis 1 'arbitrary'."""
    c = pl.program_id(0)
    n = pl.program_id(1)
    last_n = pl.num_programs(1) - 1

    # (Re)initialise the vector accumulator at the start of each chunk.
    @pl.when(n == 0)
    def _init():
        acc_ref[...] = jnp.zeros_like(acc_ref)

    # ---- streamed term: sum((u @ V_tile - code_length * S_tile)^2) ----------
    # V streams lane-dense as (K, TN) bf16.  Feed the MXU natively in bf16 via
    # a hi/lo split of u (V is exact in bf16, so the only rounding left is u's
    # low mantissa bits: ~2^-17 relative, far below the test tolerance).
    u = u_ref[...]                                        # (B, K) f32, resident
    u_hi = u.astype(jnp.bfloat16)
    u_lo = (u - u_hi.astype(jnp.float32)).astype(jnp.bfloat16)
    vt = vt_ref[...]                                      # (K, TN) bf16
    uv = (jnp.dot(u_hi, vt, preferred_element_type=jnp.float32)
          + jnp.dot(u_lo, vt, preferred_element_type=jnp.float32))   # (B, TN)
    d = uv - code_length * s_ref[...].astype(jnp.float32)
    # Element-wise VMEM accumulation: no cross-lane reduce or SMEM scalar
    # round-trip on the loop-carried critical path of each grid step.
    acc_ref[...] += d * d

    # ---- finalize: one reduction per chunk, publish the partial sum ---------
    @pl.when(n == last_n)
    def _finalize():
        out_ref[...] = jnp.full(out_ref.shape, jnp.sum(acc_ref[...]),
                                dtype=jnp.float32)

    # ---- small O(B*B)/O(B*C)/O(B*K) terms: computed exactly once, chunk 0 ---
    @pl.when((c == 0) & (n == last_n))
    def _small_terms():
        g = g_ref[...]
        ug = lax.dot_general(u, g, (((1,), (1,)), ((), ())),
                             preferred_element_type=jnp.float32)        # (B, B)
        d1 = ug - code_length * s1_ref[...]
        uw = jnp.dot(u, w_ref[...], preferred_element_type=jnp.float32)  # (B, C)
        dl = uw - l_ref[...]
        dq = vo_ref[...] - 0.5 * (u + g)                                 # (B, K)
        small = (mu * jnp.sum(d1 * d1)
                 + alpha * jnp.sum(dl * dl)
                 + gamma * jnp.sum(dq * dq))
        out_ref[...] = out_ref[...] + small


def dchuc_loss(u, g, Vt, S, S_1, V_omega, W, L, *,
               gamma, code_length, num_train, alpha, mu, tile_n=None):
    """Pallas TPU implementation of DCHUCLoss.forward.

    Vt is the database codes transposed to (K, N) — ideally the bf16, padded
    output of prepare_streams(); S is the (B, N) similarity matrix — ideally
    the bf16 output of prepare_streams().  Raw f32 inputs are accepted and
    converted / padded per call as a (slower) fallback.
    """
    u = jnp.asarray(u, jnp.float32)
    g = jnp.asarray(g, jnp.float32)
    S_1 = jnp.asarray(S_1, jnp.float32)
    V_omega = jnp.asarray(V_omega, jnp.float32)
    W = jnp.asarray(W, jnp.float32)
    L = jnp.asarray(L, jnp.float32)

    B, K = u.shape
    if Vt.shape[0] != K:
        raise ValueError("Vt must be (code_length, N): pass V.T or the "
                         "output of prepare_streams().")
    N_in = Vt.shape[1]
    C = W.shape[1]

    tn, nt, nc = _plan_tiles(K, B, N_in, tile_n)
    n_pad = nt * tn
    tpc = nt // nc                      # tiles per chunk

    Vt_b = Vt if Vt.dtype == jnp.bfloat16 else jnp.asarray(Vt, jnp.bfloat16)
    S_b = S if S.dtype == jnp.bfloat16 else jnp.asarray(S, jnp.bfloat16)
    if n_pad != N_in:                   # fallback path; zero padding adds 0
        Vt_b = jnp.pad(Vt_b, ((0, 0), (0, n_pad - N_in)))
        S_b = jnp.pad(S_b, ((0, 0), (0, n_pad - N_in)))

    kernel = functools.partial(
        _dchuc_kernel,
        gamma=float(gamma), code_length=float(code_length),
        alpha=float(alpha), mu=float(mu))

    def small_spec(shape):
        return pl.BlockSpec(shape, lambda c, n: (0, 0))

    cost = pl.CostEstimate(
        flops=4 * B * n_pad * K + 2 * B * B * K + 2 * B * K * C + 6 * B * K,
        transcendentals=0,
        bytes_accessed=2 * (K * n_pad + B * n_pad)
        + 4 * (3 * B * K + B * B + K * C + B * C) + 4 * nc * 8 * 128)

    partials = pl.pallas_call(
        kernel,
        out_shape=jax.ShapeDtypeStruct((nc, 8, 128), jnp.float32),
        grid=(nc, tpc),
        in_specs=[
            small_spec((B, K)),                                      # u
            pl.BlockSpec((K, tn), lambda c, n: (0, c * tpc + n)),    # V^T (streamed)
            pl.BlockSpec((B, tn), lambda c, n: (0, c * tpc + n)),    # S   (streamed)
            small_spec((B, K)),                                      # g
            small_spec((B, B)),                                      # S_1
            small_spec((K, C)),                                      # W
            small_spec((B, C)),                                      # L
            small_spec((B, K)),                                      # V_omega
        ],
        out_specs=pl.BlockSpec((1, 8, 128), lambda c, n: (c, 0, 0)),
        scratch_shapes=[pltpu.VMEM((B, tn), jnp.float32)],
        compiler_params=pltpu.CompilerParams(
            dimension_semantics=("parallel", "arbitrary"),
            vmem_limit_bytes=32 * 1024 * 1024),
        cost_estimate=cost,
    )(u, Vt_b, S_b, g, S_1, W, L, V_omega)

    return jnp.sum(partials[:, 0, 0]) / jnp.float32(num_train * B)


def dchuc_loss_ref(u, g, V, S, S_1, V_omega, W, L, *,
                   gamma, code_length, num_train, alpha, mu):
    """Plain-JAX reference (mirrors the PyTorch forward)."""
    batch_size = u.shape[0]
    square_loss = (u @ V.T - code_length * S) ** 2
    square_loss_1 = mu * (u @ g.T - code_length * S_1) ** 2
    label_loss = alpha * (u @ W - L) ** 2
    quantization_loss = gamma * (V_omega - 0.5 * (u + g)) ** 2
    return (square_loss.sum() + quantization_loss.sum()
            + label_loss.sum() + square_loss_1.sum()) / (num_train * batch_size)


if __name__ == "__main__":
    def make_inputs(key, B, K, N, C):
        ks = jax.random.split(key, 8)
        u = jnp.tanh(jax.random.normal(ks[0], (B, K), jnp.float32))
        g = jnp.sign(jax.random.normal(ks[1], (B, K), jnp.float32))
        V = jnp.sign(jax.random.normal(ks[2], (N, K), jnp.float32))
        S = (jax.random.uniform(ks[3], (B, N)) > 0.5).astype(jnp.float32)
        S_1 = (jax.random.uniform(ks[4], (B, B)) > 0.5).astype(jnp.float32)
        V_omega = jnp.sign(jax.random.normal(ks[5], (B, K), jnp.float32))
        W = 0.1 * jax.random.normal(ks[6], (K, C), jnp.float32)
        L = (jax.random.uniform(ks[7], (B, C)) > 0.5).astype(jnp.float32)
        return u, g, V, S, S_1, V_omega, W, L

    key = jax.random.PRNGKey(0)
    k1, k2, k3 = jax.random.split(key, 3)

    cases = (
        # (B, K, N, C, tile_n)
        (8, 32, 16, 8, None),    # tiny N, single padded tile, grid (1,1)
        (8, 32, 600, 8, None),   # one wide tile
        (8, 32, 600, 8, 256),    # forced multi-tile streaming + accumulation
    )
    for (B, K, N, C, tile_n), kk in zip(cases, (k1, k2, k3)):
        u, g, V, S, S_1, V_omega, W, L = make_inputs(kk, B, K, N, C)
        hp = dict(gamma=1.0, code_length=K, num_train=N, alpha=0.5, mu=0.2)

        ref = dchuc_loss_ref(u, g, V, S, S_1, V_omega, W, L, **hp)

        # Fast path: persistent bf16 / transposed / padded streams (prep once).
        Vt_b, S_b = prepare_streams(V, S, tile_n=tile_n)
        loss = jax.block_until_ready(
            dchuc_loss(u, g, Vt_b, S_b, S_1, V_omega, W, L, tile_n=tile_n, **hp))
        assert jnp.allclose(loss, ref, rtol=5e-4, atol=1e-3), (
            "prepared", B, K, N, C, tile_n, loss, ref)

        # Fallback path: raw f32 inputs converted / padded per call.
        loss2 = jax.block_until_ready(
            dchuc_loss(u, g, V.T, S, S_1, V_omega, W, L, tile_n=tile_n, **hp))
        assert jnp.allclose(loss2, ref, rtol=5e-4, atol=1e-3), (
            "fallback", B, K, N, C, tile_n, loss2, ref)

    print("KERNEL_OK")
</pallas_src>

<mosaic_0001>
module attributes {stable_mosaic.version = 11 : i64} {
  func.func @_dchuc_kernel(%arg0: i32, %arg1: i32, %arg2: memref<8x32xf32, #tpu.memory_space<vmem>>, %arg3: memref<32x128xbf16, #tpu.memory_space<vmem>>, %arg4: memref<8x128xbf16, #tpu.memory_space<vmem>>, %arg5: memref<8x32xf32, #tpu.memory_space<vmem>>, %arg6: memref<8x8xf32, #tpu.memory_space<vmem>>, %arg7: memref<32x8xf32, #tpu.memory_space<vmem>>, %arg8: memref<8x8xf32, #tpu.memory_space<vmem>>, %arg9: memref<8x32xf32, #tpu.memory_space<vmem>>, %arg10: memref<1x8x128xf32, #tpu.memory_space<vmem>>, %arg11: memref<8x128xf32, #tpu.memory_space<vmem>>) attributes {dimension_semantics = [#tpu.dimension_semantics<parallel>, #tpu.dimension_semantics<arbitrary>], iteration_bounds = array<i64: 1, 1>, scalar_prefetch = 0 : i64, scratch_operands = 1 : i64, tpu.core_type = #tpu.core_type<tc>, window_params = [{pipeline_mode = #tpu.pipeline_mode<synchronous>, transform_indices = @transform_0, window_bounds = array<i64: 8, 32>}, {transform_indices = @transform_1, window_bounds = array<i64: 32, 128>}, {transform_indices = @transform_2, window_bounds = array<i64: 8, 128>}, {pipeline_mode = #tpu.pipeline_mode<synchronous>, transform_indices = @transform_3, window_bounds = array<i64: 8, 32>}, {pipeline_mode = #tpu.pipeline_mode<synchronous>, transform_indices = @transform_4, window_bounds = array<i64: 8, 8>}, {pipeline_mode = #tpu.pipeline_mode<synchronous>, transform_indices = @transform_5, window_bounds = array<i64: 32, 8>}, {pipeline_mode = #tpu.pipeline_mode<synchronous>, transform_indices = @transform_6, window_bounds = array<i64: 8, 8>}, {pipeline_mode = #tpu.pipeline_mode<synchronous>, transform_indices = @transform_7, window_bounds = array<i64: 8, 32>}, {transform_indices = @transform_8, window_bounds = array<i64: 1, 8, 128>}]} {
    %c0_i32 = arith.constant 0 : i32
    %0 = arith.cmpi eq, %arg1, %c0_i32 : i32
    %1 = arith.extui %0 : i1 to i32
    %c0_i32_0 = arith.constant 0 : i32
    %2 = arith.cmpi ne, %1, %c0_i32_0 : i32
    scf.if %2 {
      %cst_17 = arith.constant 0.000000e+00 : f32
      %29 = vector.broadcast %cst_17 : f32 to vector<8x128xf32>
      %c0_18 = arith.constant 0 : index
      %c0_19 = arith.constant 0 : index
      %30 = vector.load %arg11[%c0_18, %c0_19] : memref<8x128xf32, #tpu.memory_space<vmem>>, vector<8x128xf32>
      tpu.vector_store %arg11[%c0_18, %c0_19], %29 {strides = array<i32>} : memref<8x128xf32, #tpu.memory_space<vmem>>, vector<8x128xf32>,
    } else {
    }
    %c0 = arith.constant 0 : index
    %c0_1 = arith.constant 0 : index
    %3 = vector.load %arg2[%c0, %c0_1] : memref<8x32xf32, #tpu.memory_space<vmem>>, vector<8x32xf32>
    %4 = arith.truncf %3 : vector<8x32xf32> to vector<8x32xbf16>
    %5 = arith.extf %4 : vector<8x32xbf16> to vector<8x32xf32>
    %6 = arith.subf %3, %5 : vector<8x32xf32>
    %7 = arith.truncf %6 : vector<8x32xf32> to vector<8x32xbf16>
    %c0_2 = arith.constant 0 : index
    %c0_3 = arith.constant 0 : index
    %8 = vector.load %arg3[%c0_2, %c0_3] : memref<32x128xbf16, #tpu.memory_space<vmem>>, vector<32x128xbf16>
    %cst = arith.constant dense<0.000000e+00> : vector<8x128xf32>
    %9 = tpu.matmul %4, %8, %cst {dimension_numbers = #tpu.dot_dimension_numbers<[1], [0], [0], [1], [0, 0, 1, 1], [], []>} : vector<8x32xbf16>, vector<32x128xbf16>, vector<8x128xf32> -> vector<8x128xf32>
    %cst_4 = arith.constant dense<0.000000e+00> : vector<8x128xf32>
    %10 = tpu.matmul %7, %8, %cst_4 {dimension_numbers = #tpu.dot_dimension_numbers<[1], [0], [0], [1], [0, 0, 1, 1], [], []>} : vector<8x32xbf16>, vector<32x128xbf16>, vector<8x128xf32> -> vector<8x128xf32>
    %11 = arith.addf %9, %10 : vector<8x128xf32>
    %c0_5 = arith.constant 0 : index
    %c0_6 = arith.constant 0 : index
    %12 = vector.load %arg4[%c0_5, %c0_6] : memref<8x128xbf16, #tpu.memory_space<vmem>>, vector<8x128xbf16>
    %13 = arith.extf %12 : vector<8x128xbf16> to vector<8x128xf32>
    %cst_7 = arith.constant 3.200000e+01 : f32
    %14 = vector.broadcast %cst_7 : f32 to vector<8x128xf32>
    %15 = arith.mulf %14, %13 : vector<8x128xf32>
    %16 = arith.subf %11, %15 : vector<8x128xf32>
    %c0_8 = arith.constant 0 : index
    %c0_9 = arith.constant 0 : index
    %17 = vector.load %arg11[%c0_8, %c0_9] : memref<8x128xf32, #tpu.memory_space<vmem>>, vector<8x128xf32>
    %18 = arith.mulf %16, %16 : vector<8x128xf32>
    %19 = arith.addf %17, %18 : vector<8x128xf32>
    %c0_10 = arith.constant 0 : index
    %c0_11 = arith.constant 0 : index
    %20 = vector.load %arg11[%c0_10, %c0_11] : memref<8x128xf32, #tpu.memory_space<vmem>>, vector<8x128xf32>
    tpu.vector_store %arg11[%c0_10, %c0_11], %19 {strides = array<i32>} : memref<8x128xf32, #tpu.memory_space<vmem>>, vector<8x128xf32>,
    %c0_i32_12 = arith.constant 0 : i32
    %21 = arith.cmpi eq, %arg1, %c0_i32_12 : i32
    %22 = arith.extui %21 : i1 to i32
    %c0_i32_13 = arith.constant 0 : i32
    %23 = arith.cmpi ne, %22, %c0_i32_13 : i32
    scf.if %23 {
      %c0_17 = arith.constant 0 : index
      %c0_18 = arith.constant 0 : index
      %29 = vector.load %arg11[%c0_17, %c0_18] : memref<8x128xf32, #tpu.memory_space<vmem>>, vector<8x128xf32>
      %30 = vector.shape_cast %29 : vector<8x128xf32> to vector<1x8x128xf32>
      %cst_19 = arith.constant dense<0.000000e+00> : vector<1xf32>
      %31 = vector.multi_reduction <add>, %30, %cst_19 [1, 2] : vector<1x8x128xf32> to vector<1xf32>
      %32 = vector.shape_cast %31 : vector<1xf32> to vector<1x1x1xf32>
      %33 = vector.extract %32[0, 0, 0] : f32 from vector<1x1x1xf32>
      %34 = vector.broadcast %33 : f32 to vector<1x8x128xf32>
      %c0_20 = arith.constant 0 : index
      %c0_21 = arith.constant 0 : index
      %c0_22 = arith.constant 0 : index
      %35 = vector.load %arg10[%c0_20, %c0_21, %c0_22] : memref<1x8x128xf32, #tpu.memory_space<vmem>>, vector<1x8x128xf32>
      tpu.vector_store %arg10[%c0_20, %c0_21, %c0_22], %34 {strides = array<i32>} : memref<1x8x128xf32, #tpu.memory_space<vmem>>, vector<1x8x128xf32>,
    } else {
    }
    %c0_i32_14 = arith.constant 0 : i32
    %24 = arith.cmpi eq, %arg0, %c0_i32_14 : i32
    %c0_i32_15 = arith.constant 0 : i32
    %25 = arith.cmpi eq, %arg1, %c0_i32_15 : i32
    %26 = arith.andi %24, %25 : i1
    %27 = arith.extui %26 : i1 to i32
    %c0_i32_16 = arith.constant 0 : i32
    %28 = arith.cmpi ne, %27, %c0_i32_16 : i32
    scf.if %28 {
      %c0_17 = arith.constant 0 : index
      %c0_18 = arith.constant 0 : index
      %29 = vector.load %arg5[%c0_17, %c0_18] : memref<8x32xf32, #tpu.memory_space<vmem>>, vector<8x32xf32>
      %cst_19 = arith.constant dense<0.000000e+00> : vector<8x8xf32>
      %30 = tpu.matmul %3, %29, %cst_19 {dimension_numbers = #tpu.dot_dimension_numbers<[1], [1], [0], [0], [0, 0, 1, 0], [], []>} : vector<8x32xf32>, vector<8x32xf32>, vector<8x8xf32> -> vector<8x8xf32>
      %c0_20 = arith.constant 0 : index
      %c0_21 = arith.constant 0 : index
      %31 = vector.load %arg6[%c0_20, %c0_21] : memref<8x8xf32, #tpu.memory_space<vmem>>, vector<8x8xf32>
      %cst_22 = arith.constant 3.200000e+01 : f32
      %32 = vector.broadcast %cst_22 : f32 to vector<8x8xf32>
      %33 = arith.mulf %32, %31 : vector<8x8xf32>
      %34 = arith.subf %30, %33 : vector<8x8xf32>
      %c0_23 = arith.constant 0 : index
      %c0_24 = arith.constant 0 : index
      %35 = vector.load %arg7[%c0_23, %c0_24] : memref<32x8xf32, #tpu.memory_space<vmem>>, vector<32x8xf32>
      %cst_25 = arith.constant dense<0.000000e+00> : vector<8x8xf32>
      %36 = tpu.matmul %3, %35, %cst_25 {dimension_numbers = #tpu.dot_dimension_numbers<[1], [0], [0], [1], [0, 0, 1, 1], [], []>} : vector<8x32xf32>, vector<32x8xf32>, vector<8x8xf32> -> vector<8x8xf32>
      %c0_26 = arith.constant 0 : index
      %c0_27 = arith.constant 0 : index
      %37 = vector.load %arg8[%c0_26, %c0_27] : memref<8x8xf32, #tpu.memory_space<vmem>>, vector<8x8xf32>
      %38 = arith.subf %36, %37 : vector<8x8xf32>
      %c0_28 = arith.constant 0 : index
      %c0_29 = arith.constant 0 : index
      %39 = vector.load %arg9[%c0_28, %c0_29] : memref<8x32xf32, #tpu.memory_space<vmem>>, vector<8x32xf32>
      %40 = arith.addf %3, %29 : vector<8x32xf32>
      %cst_30 = arith.constant 5.000000e-01 : f32
      %41 = vector.broadcast %cst_30 : f32 to vector<8x32xf32>
      %42 = arith.mulf %41, %40 : vector<8x32xf32>
      %43 = arith.subf %39, %42 : vector<8x32xf32>
      %44 = arith.mulf %34, %34 : vector<8x8xf32>
      %45 = vector.shape_cast %44 : vector<8x8xf32> to vector<1x8x8xf32>
      %cst_31 = arith.constant dense<0.000000e+00> : vector<1xf32>
      %46 = vector.multi_reduction <add>, %45, %cst_31 [1, 2] : vector<1x8x8xf32> to vector<1xf32>
      %47 = vector.shape_cast %46 : vector<1xf32> to vector<1x1x1xf32>
      %48 = vector.extract %47[0, 0, 0] : f32 from vector<1x1x1xf32>
      %cst_32 = arith.constant 2.000000e-01 : f32
      %49 = arith.mulf %cst_32, %48 : f32
      %50 = arith.mulf %38, %38 : vector<8x8xf32>
      %51 = vector.shape_cast %50 : vector<8x8xf32> to vector<1x8x8xf32>
      %cst_33 = arith.constant dense<0.000000e+00> : vector<1xf32>
      %52 = vector.multi_reduction <add>, %51, %cst_33 [1, 2] : vector<1x8x8xf32> to vector<1xf32>
      %53 = vector.shape_cast %52 : vector<1xf32> to vector<1x1x1xf32>
      %54 = vector.extract %53[0, 0, 0] : f32 from vector<1x1x1xf32>
      %cst_34 = arith.constant 5.000000e-01 : f32
      %55 = arith.mulf %cst_34, %54 : f32
      %56 = arith.addf %49, %55 : f32
      %57 = arith.mulf %43, %43 : vector<8x32xf32>
      %58 = vector.shape_cast %57 : vector<8x32xf32> to vector<1x8x32xf32>
      %cst_35 = arith.constant dense<0.000000e+00> : vector<1xf32>
      %59 = vector.multi_reduction <add>, %58, %cst_35 [1, 2] : vector<1x8x32xf32> to vector<1xf32>
      %60 = vector.shape_cast %59 : vector<1xf32> to vector<1x1x1xf32>
      %61 = vector.extract %60[0, 0, 0] : f32 from vector<1x1x1xf32>
      %cst_36 = arith.constant 1.000000e+00 : f32
      %62 = arith.mulf %cst_36, %61 : f32
      %63 = arith.addf %56, %62 : f32
      %c0_37 = arith.constant 0 : index
      %c0_38 = arith.constant 0 : index
      %c0_39 = arith.constant 0 : index
      %64 = vector.load %arg10[%c0_37, %c0_38, %c0_39] : memref<1x8x128xf32, #tpu.memory_space<vmem>>, vector<1x8x128xf32>
      %65 = vector.broadcast %63 : f32 to vector<1x8x128xf32>
      %66 = arith.addf %64, %65 : vector<1x8x128xf32>
      %c0_40 = arith.constant 0 : index
      %c0_41 = arith.constant 0 : index
      %c0_42 = arith.constant 0 : index
      %67 = vector.load %arg10[%c0_40, %c0_41, %c0_42] : memref<1x8x128xf32, #tpu.memory_space<vmem>>, vector<1x8x128xf32>
      tpu.vector_store %arg10[%c0_40, %c0_41, %c0_42], %66 {strides = array<i32>} : memref<1x8x128xf32, #tpu.memory_space<vmem>>, vector<1x8x128xf32>,
    } else {
    }
    return
  }
  func.func @transform_0(%arg0: i32, %arg1: i32) -> (i32, i32) {
    %c0_i32 = arith.constant 0 : i32
    %c0_i32_0 = arith.constant 0 : i32
    %c0_i32_1 = arith.constant 0 : i32
    return %c0_i32, %c0_i32_0 : i32, i32
  }
  func.func @transform_1(%arg0: i32, %arg1: i32) -> (i32, i32) {
    %c1_i32 = arith.constant 1 : i32
    %0 = arith.muli %arg0, %c1_i32 : i32
    %1 = arith.addi %0, %arg1 : i32
    %c0_i32 = arith.constant 0 : i32
    %c0_i32_0 = arith.constant 0 : i32
    return %c0_i32, %1 : i32, i32
  }
  func.func @transform_2(%arg0: i32, %arg1: i32) -> (i32, i32) {
    %c1_i32 = arith.constant 1 : i32
    %0 = arith.muli %arg0, %c1_i32 : i32
    %1 = arith.addi %0, %arg1 : i32
    %c0_i32 = arith.constant 0 : i32
    %c0_i32_0 = arith.constant 0 : i32
    return %c0_i32, %1 : i32, i32
  }
  func.func @transform_3(%arg0: i32, %arg1: i32) -> (i32, i32) {
    %c0_i32 = arith.constant 0 : i32
    %c0_i32_0 = arith.constant 0 : i32
    %c0_i32_1 = arith.constant 0 : i32
    return %c0_i32, %c0_i32_0 : i32, i32
  }
  func.func @transform_4(%arg0: i32, %arg1: i32) -> (i32, i32) {
    %c0_i32 = arith.constant 0 : i32
    %c0_i32_0 = arith.constant 0 : i32
    %c0_i32_1 = arith.constant 0 : i32
    return %c0_i32, %c0_i32_0 : i32, i32
  }
  func.func @transform_5(%arg0: i32, %arg1: i32) -> (i32, i32) {
    %c0_i32 = arith.constant 0 : i32
    %c0_i32_0 = arith.constant 0 : i32
    %c0_i32_1 = arith.constant 0 : i32
    return %c0_i32, %c0_i32_0 : i32, i32
  }
  func.func @transform_6(%arg0: i32, %arg1: i32) -> (i32, i32) {
    %c0_i32 = arith.constant 0 : i32
    %c0_i32_0 = arith.constant 0 : i32
    %c0_i32_1 = arith.constant 0 : i32
    return %c0_i32, %c0_i32_0 : i32, i32
  }
  func.func @transform_7(%arg0: i32, %arg1: i32) -> (i32, i32) {
    %c0_i32 = arith.constant 0 : i32
    %c0_i32_0 = arith.constant 0 : i32
    %c0_i32_1 = arith.constant 0 : i32
    return %c0_i32, %c0_i32_0 : i32, i32
  }
  func.func @transform_8(%arg0: i32, %arg1: i32) -> (i32, i32, i32) {
    %c0_i32 = arith.constant 0 : i32
    %c0_i32_0 = arith.constant 0 : i32
    %c0_i32_1 = arith.constant 0 : i32
    return %arg0, %c0_i32, %c0_i32_0 : i32, i32, i32
  }
}

</mosaic_0001>

<bundles_post_ra>
// kernel: tpu_custom_call.1
= control target key start
LH: loop header
LB: loop body
LE: loop exit
PB: predicated region body
PF: predicated region fallthrough
CT: control target
= control target key end

     0   :  { %13 = vsyncpa [#allocation4], 0  ;;  %s673_s0 = inlined_call_operand.vmem [shape: f32[8,32], index: 0, kind: input, shape index: {}]   ;;  %s674_s1 = inlined_call_operand.vmem [shape: bf16[32,128], index: 1, kind: input, shape index: {}]   ;;  %s675_s2 = inlined_call_operand.hbm [shape: bf16[8,128], index: 2, kind: input, shape index: {}]   ;;  %s676_s3 = inlined_call_operand.vmem [shape: f32[8,32], index: 3, kind: input, shape index: {}]   ;;  %s677_s4 = inlined_call_operand.vmem [shape: f32[8,8], index: 4, kind: input, shape index: {}]   ;;  %s678_s5 = inlined_call_operand.vmem [shape: f32[32,8], index: 5, kind: input, shape index: {}]   ;;  %s679_s6 = inlined_call_operand.vmem [shape: f32[8,8], index: 6, kind: input, shape index: {}]   ;;  %s680_s7 = inlined_call_operand.hbm [shape: f32[8,32], index: 7, kind: input, shape index: {}]   ;;  %s681_s8 = inlined_call_operand.hbm [shape: f32[1,8,128], index: 8, kind: output, shape index: {}]  }
   0x1   :  { %14 = vsyncpa [#allocation7], 0 }
   0x2   :  { %15 = vsyncpa [#allocation5], 0  ;;  %s574_s27 = smov [#allocation3]   ;;  %s575_s29 = smov [#allocation6]  }
   0x3   :  { %s35_s28 = sshll.u32 %s574_s27, 4  ;;  %s53_s30 = sshll.u32 %s575_s29, 4  ;;  %s36_s28 = int_to_ptr.vmem [resolvable:$true] %s35_s28  ;;  %s54_s30 = int_to_ptr.vmem [resolvable:$true] %s53_s30 }
   0x4   :  { %s516_s9 = scalar_lea.vmem %s36_s28, 64  ;;  %p521_p1 = scmp.lt.s32.totalorder %s36_s28, %s36_s28 }
   0x5   :  { %p517_p0 = scmp.ne.s32.totalorder %s36_s28, %s516_s9  ;;  %p522_p2 = scmp.lt.s32.totalorder %s516_s9, %s516_s9 }
   0x7   :  { %p523_p3 = por %p522_p2, %p521_p1 }
   0x9   :  { %p524_p4 = pnand %p523_p3, %p517_p0 }
   0xb   :  { %527 = shalt.err (!%p524_p4)
}
   0xc   :  { %38 = dma.hbm_to_vmem [thread:$0]  %s675_s2, 64, %s36_s28, [#allocation4]  }
   0xd   :  { %s536_s12 = scalar_lea.vmem %s54_s30, 128  ;;  %p541_p6 = scmp.lt.s32.totalorder %s54_s30, %s54_s30 }
   0xe   :  { %p537_p5 = scmp.ne.s32.totalorder %s54_s30, %s536_s12  ;;  %p542_p7 = scmp.lt.s32.totalorder %s536_s12, %s536_s12 }
  0x10   :  { %p543_p8 = por %p542_p7, %p541_p6 }
  0x12   :  { %p544_p9 = pnand %p543_p8, %p537_p5 }
  0x14   :  { %547 = shalt.err (!%p544_p9)
}
  0x15   :  { %56 = dma.hbm_to_vmem [thread:$0]  %s680_s7, 128, %s54_s30, [#allocation7]  }
  0x16   :  { %568 = dma.done.wait [#allocation4], 64  }
  0x17   :  { %569 = vsyncadd [#allocation4], 4294967232 }
  0x18   :  { %570 = dma.done.wait [#allocation7], 128  }
  0x19   :  { %571 = vsyncadd [#allocation7], 4294967168  ;;  %v576_v0 = vmov 0.0   ;;  %vm577_vm0 = vmmov 0   ;;  %v506_v1 = vld [vmem:[%s674_s1 + $0x8] sm:$0xff]   ;;  %v507_v2 = vld [vmem:[%s674_s1] sm:$0xff]  }
  0x1a   :  { %461 = vmatprep.subr.bf16.mxu0 %v576_v0  ;;  %469 = vmatprep.subr.bf16.mxu1 %v576_v0  ;;  %v81_v3 = vld [vmem:[%s673_s0] sm:$0xff]  ;;  %vm102_vm1 = vcmask 261120   ;;  %v300_v7 = vld [vmem:[%s678_s5 + $0x18] sm:$0xff]  ;;  %v299_v10 = vld [vmem:[%s678_s5 + $0x10] sm:$0xff]  ;;  %vm378_vm2 = vcmask 64512   ;;  %s578_s13 = smov [#allocation8]  }
  0x1b   :  { %465 = vmatprep.mubr.msk.bf16.mxu0 %vm577_vm0, %v576_v0  ;;  %473 = vmatprep.mubr.msk.bf16.mxu1 %vm577_vm0, %v576_v0  ;;  %v82_v4 = vpack.c.bf16 %v81_v3, %v81_v3  ;;  %v217_v9 = vld [vmem:[%s676_s3] sm:$0xff]  ;;  %v298_v11 = vld [vmem:[%s678_s5 + $0x8] sm:$0xff]  ;;  %s425_s14 = sshll.u32 %s578_s13, 4  ;;  %s426_s14 = int_to_ptr.vmem [resolvable:$true] %s425_s14 }
  0x1c   :  { %462 = vmatpush3.bf16.msra.mxu0 %v506_v1  ;;  %470 = vmatpush3.bf16.msra.mxu1 %v506_v1  ;;  %v297_v12 = vld [vmem:[%s678_s5] sm:$0xff]  ;;  %v374_v15 = vadd.f32 %v217_v9, %v81_v3  ;;  %s548_s2 = scalar_lea.vmem %s426_s14, 128  ;;  %p553_p11 = scmp.lt.s32.totalorder %s426_s14, %s426_s14 }
  0x1d   :  { %463 = vmatprep.subr.bf16.mxu0 %v576_v0  ;;  %471 = vmatprep.subr.bf16.mxu1 %v576_v0  ;;  %v83_v5 = vunpack.c.l.bf16 %v82_v4  ;;  %v189_v13 = vld [vmem:[#allocation3] sm:$0xf]  ;;  %v373_v25 = vld [vmem:[#allocation6] sm:$0xff]  ;;  %p549_p10 = scmp.ne.s32.totalorder %s426_s14, %s548_s2  ;;  %p554_p12 = scmp.lt.s32.totalorder %s548_s2, %s548_s2 }
  0x1e   :  { %v190_v14 = vunpack.c.l.bf16 %v189_v13  ;;  %v375_v21 = vmul.f32 0.5, %v374_v15  ;;  %v294_v24 = vld [vmem:[%s677_s4] sm:$0xff] }
  0x1f   :  { %v84_v6 = vsub.f32 %v81_v3, %v83_v5  ;;  %v371_v29 = vld [vmem:[%s679_s6] sm:$0xff]  ;;  %v295_v31 = vmul.f32 32.0, %v294_v24  ;;  %p555_p13 = por %p554_p12, %p553_p11 }
  0x20   :  { %464 = vmatpush3.bf16.msra.mxu0 %v507_v2  ;;  %472 = vmatpush3.bf16.msra.mxu1 %v507_v2  ;;  %v191_v17 = vmul.f32 32.0, %v190_v14  ;;  %v376_v32 = vsub.f32 %v373_v25, %v375_v21 }
  0x21   :  { %477 = vmatprep.subr.mxu0 %v576_v0  ;;  %482 = vmatprep.subr.mxu1 %v576_v0  ;;  %v85_v8 = vpack.c.bf16 %v84_v6, %v84_v6  ;;  %p556_p0 = pnand %p555_p13, %p549_p10 }
  0x22   :  { %v403_v40 = vmul.f32 %v376_v32, %v376_v32 }
  0x23   :  { %474 = vmatmul.mubr.msk.bf16.vlgmr.msra.gmra.mxu1 %vm102_vm1, %v82_v4  ;;  %466 = vmatmul.mubr.msk.bf16.vlgmr.msra.gmra.mxu0 %vm102_vm1, %v85_v8 }
  0x24   :  { %483 = vmatpush3.msra.mxu1 %v300_v7  ;;  %490 = vmatprep.mubr.msk.f32.mxu1 %vm577_vm0, %v576_v0  ;;  %v404_v45 = vsel %vm102_vm1, %v403_v40, 0.0 }
  0x25   :  { %484 = vmatprep.subr.mxu1 %v576_v0  ;;  %478 = vmatpush3.xpose.msk.msra.mxu0 %vm102_vm1, %v217_v9 }
  0x26   :  { %485 = vmatpush3.msra.mxu1 %v299_v10  ;;  %479 = vmatprep.mubr.msk.f32.mxu0 %vm577_vm0, %v576_v0 }
  0x27   :  { %486 = vmatprep.subr.mxu1 %v576_v0 }
  0x28   :  { %487 = vmatpush3.msra.mxu1 %v298_v11 }
  0x29   :  { %488 = vmatprep.subr.mxu1 %v576_v0 }
  0x2a   :  { %489 = vmatpush3.msra.mxu1 %v297_v12 }
  0x2b   :  { %491 = vmatmul.mubr.msk.f32.vlgmr.msra.gmra.mxu1 %vm102_vm1, %v81_v3  ;;  %480 = vmatmul.mubr.msk.f32.vlgmr.msra.gmra.mxu0 %vm102_vm1, %v81_v3 }
  0xe3   :  { %v183_v16 = vpop.f32.mrf.mxu1  ;;  %v140_v18 = vpop.f32.mrf.mxu0 }
  0xe4   :  { %v184_v20 = vadd.f32 %v183_v16, %v140_v18 }
  0xe5   :  { %v475_v19 = vpop.f32.mrf.mxu1  ;;  %v467_v22 = vpop.f32.mrf.mxu0 }
  0xe6   :  { %v192_v26 = vsub.f32 %v184_v20, %v191_v17 }
  0xe7   :  { %v186_v23 = vpop.f32.mrf.mxu1  ;;  %v143_v27 = vpop.f32.mrf.mxu0 }
  0xe8   :  { %v194_v30 = vmul.f32 %v192_v26, %v192_v26 }
  0xe9   :  { %v476_v28 = vpop.f32.mrf.mxu1  ;;  %v468_v33 = vpop.f32.mrf.mxu0 }
  0xea   :  { %201 = vadd.xlane.f32.xlu0 %v194_v30 }
  0xeb   :  { %v367_v34 = vpop.f32.mrf.mxu1  ;;  %v290_v36 = vpop.f32.mrf.mxu0 }
  0xec   :  { %v372_v35 = vsub.f32 %v367_v34, %v371_v29  ;;  %v296_v38 = vsub.f32 %v290_v36, %v295_v31 }
  0xed   :  { %v492_v37 = vpop.f32.mrf.mxu1  ;;  %v481_v41 = vpop.f32.mrf.mxu0 }
  0xee   :  { %v390_v39 = vmul.f32 %v372_v35, %v372_v35  ;;  %v377_v42 = vmul.f32 %v296_v38, %v296_v38 }
  0xf0   :  { %v391_v43 = vsel %vm378_vm2, %v390_v39, 0.0  ;;  %v379_v44 = vsel %vm378_vm2, %v377_v42, 0.0 }
  0xf1   :  { %392 = vadd.xlane.f32.xlu1 %v391_v43  ;;  %380 = vadd.xlane.f32.xlu0 %v379_v44 }
  0xf5   :  { %405 = vadd.xlane.f32.xlu1 %v404_v45 }
 0x173   :  { %v202_v46 = vpop.xlane.xlu0 %201 }
 0x174   :  { %v203_v47 = vrot.slane %v202_v46, 4 }
 0x176   :  { %v204_v48 = vadd.f32 %v203_v47, %v202_v46 }
 0x178   :  { %v205_v49 = vrot.slane %v204_v48, 2 }
 0x17a   :  { %v393_v50 = vpop.xlane.xlu1 %392  ;;  %v381_v52 = vpop.xlane.xlu0 %380  ;;  %v206_v53 = vadd.f32 %v205_v49, %v204_v48 }
 0x17b   :  { %v394_v51 = vrot.slane %v393_v50, 4  ;;  %v382_v55 = vrot.slane %v381_v52, 4 }
 0x17c   :  { %v207_v57 = vrot.slane %v206_v53, 1 }
 0x17d   :  { %v395_v54 = vadd.f32 %v394_v51, %v393_v50  ;;  %v383_v59 = vadd.f32 %v382_v55, %v381_v52 }
 0x17e   :  { %v406_v56 = vpop.xlane.xlu1 %405  ;;  %v208_v61 = vadd.f32 %v207_v57, %v206_v53 }
 0x17f   :  { %v396_v58 = vrot.slane %v395_v54, 2  ;;  %v407_v60 = vrot.slane %v406_v56, 4  ;;  %v384_v62 = vrot.slane %v383_v59, 2 }
 0x180   :  { %493 = vpush %v208_v61 }
 0x181   :  { %v408_v63 = vadd.f32 %v407_v60, %v406_v56  ;;  %v397_v0 = vadd.f32 %v396_v58, %v395_v54  ;;  %v385_v1 = vadd.f32 %v384_v62, %v383_v59 }
 0x183   :  { %v409_v2 = vrot.slane %v408_v63, 2  ;;  %v398_v3 = vrot.slane %v397_v0, 1  ;;  %v386_v5 = vrot.slane %v385_v1, 1 }
 0x185   :  { %v410_v4 = vadd.f32 %v409_v2, %v408_v63  ;;  %v399_v6 = vadd.f32 %v398_v3, %v397_v0  ;;  %v387_v7 = vadd.f32 %v386_v5, %v385_v1 }
 0x187   :  { %v411_v8 = vrot.slane %v410_v4, 1  ;;  %495 = vpush %v387_v7 }
 0x188   :  { %497 = vpush %v399_v6 }
 0x189   :  { %v412_v9 = vadd.f32 %v411_v8, %v410_v4 }
 0x18b   :  { %499 = vpush %v412_v9 }
 0x1b1   :  { %s494_s4 = spop %493 }
 0x1b2   :  { %v210_v10 = vstv %s494_s4 }
 0x1b8   :  { %s496_s6 = spop %495 }
 0x1b9   :  { %s389_s29 = smul.f32 0.2, %s496_s6  ;;  %s498_s30 = spop %497 }
 0x1ba   :  { %s401_s9 = smul.f32 0.5, %s498_s30 }
 0x1bc   :  { %s500_s10 = spop %499  ;;  %s402_s11 = sadd.f32 %s401_s9, %s389_s29 }
 0x1be   :  { %s414_s12 = sadd.f32 %s500_s10, %s402_s11 }
 0x1c0   :  { %v416_v11 = vstv %s414_s12 }
 0x1c1   :  { %v417_v12 = vadd.f32 %v416_v11, %v210_v10 }
 0x1c3   :  { %418 = vst [vmem:[#allocation8] sm:$0xff] %v417_v12 }
 0x1c4   :  { %559 = shalt.err (!%p556_p0)
}
 0x1c5   :  { %428 = dma.vmem_to_hbm [thread:$0]  %s426_s14, 128, %s681_s8, [#allocation5]  }
 0x1c6   :  { %572 = dma.done.wait [#allocation5], 128  }
 0x1c7   :  { %573 = vsyncadd [#allocation5], 4294967168 }
 0x1c8   :  { %432 = vsyncpa [#allocation4], 1 }
 0x1c9   :  { %433 = vsyncpa [#allocation7], 1 }
 0x1ca   :  { %434 = vsyncpa [#allocation5], 1 }

</bundles_post_ra>
